<compile_context>
chip_gen: v7x
topology: tpu7x:2x2x1
jax: 0.10.0
libtpu: 0.0.40
codegen_flags: <defaults>
</compile_context>

<pallas_src>
import jax
import jax.numpy as jnp
from jax.experimental import pallas as pl
from jax.experimental.pallas import tpu as pltpu


def get_padding(kernel_size, dilation=1):
    return int((kernel_size * dilation - dilation) / 2)


def _leaky(x, slope):
    return jnp.where(x >= 0, x, slope * x)


# ---------------------------------------------------------------------------
# Pallas kernel: multi-branch dilated/strided Conv1d + leaky-relu + branch sum
# ---------------------------------------------------------------------------
def _make_group_kernel(branch_taps, cin, ttile, slope):
    """Kernel over one (batch, time-tile) grid cell.

    wins_ref : [s, Cin, Ttile + Qmax]   stride-phase decomposed input window
    w_ref    : [nb, Cout, Kmax*Cin]     lane-dense fused weights (resident)
    b_ref    : [nb, Cout, 1]            f32 biases
    o_ref    : [Cout, Ttile]
    acc_ref  : [Cout, Ttile] f32 VMEM scratch (branch accumulator)

    branch_taps[i] is a static tuple of (phase, offset) pairs: output index t
    of branch i, tap k reads wins[phase, :, offset + t].
    """
    nb = len(branch_taps)

    def kernel(wins_ref, w_ref, b_ref, o_ref, acc_ref):
        for i, taps in enumerate(branch_taps):          # static python loops
            br = None
            for k, (r, q) in enumerate(taps):
                x_tap = wins_ref[r, :, q:q + ttile]           # [Cin, Ttile] (bf16)
                w_tap = w_ref[i, :, k * cin:(k + 1) * cin]    # [Cout, Cin]  (bf16)
                d = jnp.dot(w_tap, x_tap, preferred_element_type=jnp.float32)
                br = d if br is None else br + d              # fused-K accumulation
            br = br + b_ref[i]                                # f32 bias
            if slope is not None:
                br = _leaky(br, slope)
            if nb == 1:
                o_ref[...] = br.astype(o_ref.dtype)
            elif i == 0:
                acc_ref[...] = br
            elif i < nb - 1:
                acc_ref[...] = acc_ref[...] + br
            else:
                o_ref[...] = (acc_ref[...] + br).astype(o_ref.dtype)

    return kernel


# ---------------------------------------------------------------------------
# Wrapper: sum over branches of leaky_relu(Conv1d_i(x))  (slope=None => no act)
# ---------------------------------------------------------------------------
def conv1d_group_pallas(x, weights, biases, *, stride, dilations, paddings,
                        slope, compute_dtype=jnp.bfloat16):
    """x: [B, Cin, T] f32, weights: list of [Cout, Cin, K_i], biases: list of [Cout]."""
    B, Cin, T = x.shape
    Cout = int(weights[0].shape[0])
    nb = len(weights)
    s = int(stride)
    Ks = [int(w.shape[2]) for w in weights]
    Kmax = max(Ks)

    # Output length (must agree across branches, as in the reference module).
    touts = [(T + 2 * p - d * (K - 1) - 1) // s + 1
             for K, d, p in zip(Ks, dilations, paddings)]
    assert all(t == touts[0] for t in touts), "branch outputs must share length"
    Tout = touts[0]

    # Static tap table: out[t] of branch i, tap k reads phase[r][t + q] with
    #   o = (Pmax - p_i) + k*d_i,  r = o % s,  q = o // s
    P = max(paddings)
    branch_taps = []
    qmax = 0
    for K, d, p in zip(Ks, dilations, paddings):
        base = P - p
        taps = []
        for k in range(K):
            o = base + k * d
            taps.append((o % s, o // s))
            qmax = max(qmax, o // s)
        branch_taps.append(tuple(taps))
    branch_taps = tuple(branch_taps)

    # Time tiling: lane-dense tiles (multiple of 128), accumulator bounded to
    # ~16K f32 elements (feedback: VMEM/vreg discipline, esp. v7x 64 MiB VMEM).
    cap = max(128, ((16384 // max(Cout, 1)) // 128) * 128)
    max_ttile = min(512, cap)
    if Tout <= max_ttile:
        ttile, n_t, Tout_pad = Tout, 1, Tout
    else:
        ttile = max_ttile
        n_t = -(-Tout // ttile)
        Tout_pad = n_t * ttile

    # --- build the stride-phase decomposed, halo-windowed input (read once) ---
    Lph = Tout_pad + qmax                  # per-phase length
    total_len = Lph * s
    xc = x.astype(compute_dtype)           # bf16 at the pallas boundary
    pad_right = total_len - (T + P)
    xp = jnp.pad(xc, ((0, 0), (0, 0), (P, max(pad_right, 0))))
    if pad_right < 0:
        xp = xp[:, :, :total_len]
    # phases[b, r, ci, u] = xp[b, ci, u*s + r]
    phases = xp.reshape(B, Cin, Lph, s).transpose(0, 3, 1, 2)   # [B, s, Cin, Lph]
    Wwin = ttile + qmax
    if n_t == 1:
        wins = phases                                           # [B, s, Cin, Wwin]
    else:
        # Overlapping halo windows: ~1.1x the input bytes (NOT K-fold).
        wins = jnp.stack(
            [jax.lax.slice_in_dim(phases, j * ttile, j * ttile + Wwin, axis=3)
             for j in range(n_t)], axis=1)
        wins = wins.reshape(B * n_t, s, Cin, Wwin)

    # Lane-dense fused weights: w_fused[i, co, k*Cin + ci] = W_i[co, ci, k]
    w_rows = []
    for w, K in zip(weights, Ks):
        wf = jnp.transpose(w, (0, 2, 1)).reshape(Cout, K * Cin)
        if K < Kmax:
            wf = jnp.pad(wf, ((0, 0), (0, (Kmax - K) * Cin)))
        w_rows.append(wf)
    w_fused = jnp.stack(w_rows, axis=0).astype(compute_dtype)   # [nb, Cout, Kmax*Cin]
    b_stack = jnp.stack(biases, axis=0)[:, :, None].astype(jnp.float32)

    kernel = _make_group_kernel(branch_taps, Cin, ttile, slope)

    out = pl.pallas_call(
        kernel,
        out_shape=jax.ShapeDtypeStruct((B, Cout, Tout_pad), x.dtype),
        grid=(B, n_t),
        in_specs=[
            # per-(batch, time-tile) window; leading dim folds (b, j)
            pl.BlockSpec((None, s, Cin, Wwin), lambda b, j: (b * n_t + j, 0, 0, 0)),
            # weights / biases: constant index_map -> DMA'd once, VMEM-resident
            pl.BlockSpec((nb, Cout, Kmax * Cin), lambda b, j: (0, 0, 0)),
            pl.BlockSpec((nb, Cout, 1), lambda b, j: (0, 0, 0)),
        ],
        out_specs=pl.BlockSpec((None, Cout, ttile), lambda b, j: (b, 0, j)),
        scratch_shapes=[pltpu.VMEM((Cout, ttile), jnp.float32)],
        compiler_params=pltpu.CompilerParams(
            dimension_semantics=("parallel", "parallel"),
            vmem_limit_bytes=32 * 1024 * 1024,
        ),
    )(wins, w_fused, b_stack)

    if Tout_pad != Tout:
        out = out[:, :, :Tout]
    return out


# ---------------------------------------------------------------------------
# Module-equivalent forward passes (parameter plumbing is plain JAX glue)
# ---------------------------------------------------------------------------
def mdc_forward(x, p, compute_dtype=jnp.bfloat16):
    # sum_i leaky_relu(dilated_conv_i(x))  -- fused in one pallas_call
    y = conv1d_group_pallas(
        x, p["dconv_w"], p["dconv_b"],
        stride=1, dilations=p["dilations"], paddings=p["dconv_pad"],
        slope=0.2, compute_dtype=compute_dtype)
    # TODO(synk): fuse this strided post-conv into the branch kernel above so the
    # [B, Cout, T] intermediate never round-trips HBM (needs halo'd branch-sum
    # tiles across time-tile boundaries). Its leaky_relu IS fused in-kernel.
    y = conv1d_group_pallas(
        y, [p["post_w"]], [p["post_b"]],
        stride=p["stride"], dilations=[1], paddings=[p["post_pad"]],
        slope=0.2, compute_dtype=compute_dtype)
    return y


def sbd_block_forward(x, params, compute_dtype=jnp.bfloat16):
    assert x.shape[0] % 2 == 0, "batch must be even (real/generated pairs)"
    fmap_r, fmap_g = [], []
    for mdc_p in params["mdcs"]:
        x = mdc_forward(x, mdc_p, compute_dtype)
        f_r, f_g = jnp.split(x, 2, axis=0)
        fmap_r.append(f_r)
        fmap_g.append(f_g)
    # TODO(synk): the Cout=1 head wastes MXU rows (M=1); a VPU weighted-sum or
    # folding B into M would be faster, but this layer is a negligible fraction
    # of the work so the shared matmul kernel is reused for simplicity.
    x = conv1d_group_pallas(
        x, [params["post_w"]], [params["post_b"]],
        stride=1, dilations=[1], paddings=[3 // 2],
        slope=None, compute_dtype=compute_dtype)
    x_r, x_g = jnp.split(x, 2, axis=0)
    return x_r, x_g, fmap_r, fmap_g


# ---------------------------------------------------------------------------
# Deterministic parameter initialization (weight_norm at init == plain weight)
# ---------------------------------------------------------------------------
def init_sbd_params(key, segment_dim, strides, filters, kernel_size, dilations):
    def conv_init(key, cout, cin, k):
        kw, kb = jax.random.split(key)
        w = 0.1 * jax.random.normal(kw, (cout, cin, k), jnp.float32)
        b = 0.1 * jax.random.normal(kb, (cout,), jnp.float32)
        return w, b

    filters_in_out = [(segment_dim, filters[0])]
    for i in range(len(filters) - 1):
        filters_in_out.append((filters[i], filters[i + 1]))

    params = {"mdcs": []}
    for _s, _f, _k, _d in zip(strides, filters_in_out, kernel_size, dilations):
        cin, cout = _f
        mdc = {"dconv_w": [], "dconv_b": [], "dilations": list(_d),
               "dconv_pad": [], "stride": _s}
        for kk, dd in zip(_k, _d):
            key, sub = jax.random.split(key)
            w, b = conv_init(sub, cout, cin, kk)
            mdc["dconv_w"].append(w)
            mdc["dconv_b"].append(b)
            mdc["dconv_pad"].append(get_padding(kk, dd))
        # NOTE: replicates the PyTorch quirk -- post_conv padding uses the LAST
        # (_k, _d) of the zip loop, even though its kernel_size is 3.
        key, sub = jax.random.split(key)
        pw, pb = conv_init(sub, cout, cout, 3)
        mdc["post_w"] = pw
        mdc["post_b"] = pb
        mdc["post_pad"] = get_padding(_k[-1], _d[-1])
        params["mdcs"].append(mdc)

    last_cout = filters_in_out[-1][1]
    key, sub = jax.random.split(key)
    pw, pb = conv_init(sub, 1, last_cout, 3)
    params["post_w"] = pw
    params["post_b"] = pb
    return params


# ---------------------------------------------------------------------------
# Pure-lax reference (for numerical verification only)
# ---------------------------------------------------------------------------
def _conv1d_ref(x, w, b, stride, dilation, padding):
    y = jax.lax.conv_general_dilated(
        x, w, window_strides=(stride,), padding=[(padding, padding)],
        rhs_dilation=(dilation,), dimension_numbers=("NCH", "OIH", "NCH"),
        precision=jax.lax.Precision.HIGHEST)
    return y + b[None, :, None]


def _mdc_ref(x, p):
    acc = None
    for w, b, d, pad in zip(p["dconv_w"], p["dconv_b"], p["dilations"], p["dconv_pad"]):
        y = _leaky(_conv1d_ref(x, w, b, 1, d, pad), 0.2)
        acc = y if acc is None else acc + y
    y = _conv1d_ref(acc, p["post_w"], p["post_b"], p["stride"], 1, p["post_pad"])
    return _leaky(y, 0.2)


def sbd_block_ref(x, params):
    fmap_r, fmap_g = [], []
    for mp in params["mdcs"]:
        x = _mdc_ref(x, mp)
        f_r, f_g = jnp.split(x, 2, axis=0)
        fmap_r.append(f_r)
        fmap_g.append(f_g)
    y = _conv1d_ref(x, params["post_w"], params["post_b"], 1, 1, 3 // 2)
    x_r, x_g = jnp.split(y, 2, axis=0)
    return x_r, x_g, fmap_r, fmap_g


def _assert_close(name, a, b, rel_tol):
    a = jnp.asarray(a, jnp.float32)
    b = jnp.asarray(b, jnp.float32)
    if a.shape != b.shape:
        raise AssertionError(f"{name}: shape {a.shape} vs {b.shape}")
    err = float(jnp.max(jnp.abs(a - b)))
    scale = float(jnp.max(jnp.abs(b))) + 1e-6
    if err > rel_tol * max(1.0, scale):
        raise AssertionError(f"{name}: max abs err {err:.4e} (scale {scale:.3e})")


if __name__ == "__main__":
    key = jax.random.PRNGKey(0)

    # Small synthetic config consistent with SBDBlock.__init__
    segment_dim = 8
    strides = [1, 2]
    filters = [16, 32]
    kernel_size = [[3, 5], [3, 5]]
    dilations = [[1, 2], [1, 2]]

    kp, kx = jax.random.split(key)
    params = init_sbd_params(kp, segment_dim, strides, filters, kernel_size, dilations)

    # T=800 is still tiny but > 512 so the time-tiled (grid over T) path is exercised.
    B, T = 2, 800
    x = jax.random.normal(kx, (B, segment_dim, T), jnp.float32)

    # --- correctness check vs pure-lax reference (f32 compute path) ---
    ref_r, ref_g, ref_fr, ref_fg = sbd_block_ref(x, params)
    out_r, out_g, out_fr, out_fg = sbd_block_forward(x, params, compute_dtype=jnp.float32)
    _assert_close("x_r", out_r, ref_r, 5e-2)
    _assert_close("x_g", out_g, ref_g, 5e-2)
    for i, (a, b) in enumerate(zip(out_fr, ref_fr)):
        _assert_close(f"fmap_r[{i}]", a, b, 5e-2)
    for i, (a, b) in enumerate(zip(out_fg, ref_fg)):
        _assert_close(f"fmap_g[{i}]", a, b, 5e-2)

    # --- performance path: bf16 operands, f32 accumulation on the MXU ---
    x_r, x_g, fmap_r, fmap_g = sbd_block_forward(x, params, compute_dtype=jnp.bfloat16)
    jax.block_until_ready((x_r, x_g, fmap_r, fmap_g))
    _assert_close("x_r(bf16)", x_r, ref_r, 1e-1)
    _assert_close("x_g(bf16)", x_g, ref_g, 1e-1)

    print("KERNEL_OK")
</pallas_src>

<mosaic_0001>
module attributes {stable_mosaic.version = 11 : i64} {
  func.func @kernel(%arg0: i32, %arg1: i32, %arg2: memref<1x1x8x520xf32, #tpu.memory_space<vmem>>, %arg3: memref<2x16x40xf32, #tpu.memory_space<vmem>>, %arg4: memref<2x16x1xf32, #tpu.memory_space<vmem>>, %arg5: memref<1x16x512xf32, #tpu.memory_space<vmem>>, %arg6: memref<16x512xf32, #tpu.memory_space<vmem>>) attributes {dimension_semantics = [#tpu.dimension_semantics<parallel>, #tpu.dimension_semantics<parallel>], iteration_bounds = array<i64: 2, 2>, scalar_prefetch = 0 : i64, scratch_operands = 1 : i64, tpu.core_type = #tpu.core_type<tc>, window_params = [{transform_indices = @transform_0, window_bounds = array<i64: 1, 1, 8, 520>}, {pipeline_mode = #tpu.pipeline_mode<synchronous>, transform_indices = @transform_1, window_bounds = array<i64: 2, 16, 40>}, {pipeline_mode = #tpu.pipeline_mode<synchronous>, transform_indices = @transform_2, window_bounds = array<i64: 2, 16, 1>}, {transform_indices = @transform_3, window_bounds = array<i64: 1, 16, 512>}]} {
    %c0 = arith.constant 0 : index
    %c0_0 = arith.constant 0 : index
    %c0_1 = arith.constant 0 : index
    %c3 = arith.constant 3 : index
    %0 = vector.load %arg2[%c0, %c0_0, %c0_1, %c3] : memref<1x1x8x520xf32, #tpu.memory_space<vmem>>, vector<1x1x8x512xf32>
    %1 = vector.shape_cast %0 : vector<1x1x8x512xf32> to vector<8x512xf32>
    %c0_2 = arith.constant 0 : index
    %c0_3 = arith.constant 0 : index
    %c0_4 = arith.constant 0 : index
    %2 = vector.load %arg3[%c0_2, %c0_3, %c0_4] : memref<2x16x40xf32, #tpu.memory_space<vmem>>, vector<1x16x8xf32>
    %3 = vector.shape_cast %2 : vector<1x16x8xf32> to vector<16x8xf32>
    %cst = arith.constant dense<0.000000e+00> : vector<16x512xf32>
    %4 = tpu.matmul %3, %1, %cst {dimension_numbers = #tpu.dot_dimension_numbers<[1], [0], [0], [1], [0, 0, 1, 1], [], []>} : vector<16x8xf32>, vector<8x512xf32>, vector<16x512xf32> -> vector<16x512xf32>
    %c0_5 = arith.constant 0 : index
    %c0_6 = arith.constant 0 : index
    %c0_7 = arith.constant 0 : index
    %c4 = arith.constant 4 : index
    %5 = vector.load %arg2[%c0_5, %c0_6, %c0_7, %c4] : memref<1x1x8x520xf32, #tpu.memory_space<vmem>>, vector<1x1x8x512xf32>
    %6 = vector.shape_cast %5 : vector<1x1x8x512xf32> to vector<8x512xf32>
    %c0_8 = arith.constant 0 : index
    %c0_9 = arith.constant 0 : index
    %c8 = arith.constant 8 : index
    %7 = vector.load %arg3[%c0_8, %c0_9, %c8] : memref<2x16x40xf32, #tpu.memory_space<vmem>>, vector<1x16x8xf32>
    %8 = vector.shape_cast %7 : vector<1x16x8xf32> to vector<16x8xf32>
    %cst_10 = arith.constant dense<0.000000e+00> : vector<16x512xf32>
    %9 = tpu.matmul %8, %6, %cst_10 {dimension_numbers = #tpu.dot_dimension_numbers<[1], [0], [0], [1], [0, 0, 1, 1], [], []>} : vector<16x8xf32>, vector<8x512xf32>, vector<16x512xf32> -> vector<16x512xf32>
    %10 = arith.addf %4, %9 : vector<16x512xf32>
    %c0_11 = arith.constant 0 : index
    %c0_12 = arith.constant 0 : index
    %c0_13 = arith.constant 0 : index
    %c5 = arith.constant 5 : index
    %11 = vector.load %arg2[%c0_11, %c0_12, %c0_13, %c5] : memref<1x1x8x520xf32, #tpu.memory_space<vmem>>, vector<1x1x8x512xf32>
    %12 = vector.shape_cast %11 : vector<1x1x8x512xf32> to vector<8x512xf32>
    %c0_14 = arith.constant 0 : index
    %c0_15 = arith.constant 0 : index
    %c16 = arith.constant 16 : index
    %13 = vector.load %arg3[%c0_14, %c0_15, %c16] : memref<2x16x40xf32, #tpu.memory_space<vmem>>, vector<1x16x8xf32>
    %14 = vector.shape_cast %13 : vector<1x16x8xf32> to vector<16x8xf32>
    %cst_16 = arith.constant dense<0.000000e+00> : vector<16x512xf32>
    %15 = tpu.matmul %14, %12, %cst_16 {dimension_numbers = #tpu.dot_dimension_numbers<[1], [0], [0], [1], [0, 0, 1, 1], [], []>} : vector<16x8xf32>, vector<8x512xf32>, vector<16x512xf32> -> vector<16x512xf32>
    %16 = arith.addf %10, %15 : vector<16x512xf32>
    %c0_17 = arith.constant 0 : index
    %c0_18 = arith.constant 0 : index
    %c0_19 = arith.constant 0 : index
    %17 = vector.load %arg4[%c0_17, %c0_18, %c0_19] : memref<2x16x1xf32, #tpu.memory_space<vmem>>, vector<1x16x1xf32>
    %18 = vector.shape_cast %17 : vector<1x16x1xf32> to vector<16x1xf32>
    %19 = vector.broadcast %18 : vector<16x1xf32> to vector<16x512xf32>
    %20 = arith.addf %16, %19 : vector<16x512xf32>
    %cst_20 = arith.constant 0.000000e+00 : f32
    %21 = vector.broadcast %cst_20 : f32 to vector<16x512xf32>
    %22 = arith.cmpf oge, %20, %21 : vector<16x512xf32>
    %cst_21 = arith.constant 2.000000e-01 : f32
    %23 = vector.broadcast %cst_21 : f32 to vector<16x512xf32>
    %24 = arith.mulf %23, %20 : vector<16x512xf32>
    %25 = arith.select %22, %20, %24 : vector<16x512xi1>, vector<16x512xf32>
    %c0_22 = arith.constant 0 : index
    %c0_23 = arith.constant 0 : index
    %26 = vector.load %arg6[%c0_22, %c0_23] : memref<16x512xf32, #tpu.memory_space<vmem>>, vector<16x512xf32>
    tpu.vector_store %arg6[%c0_22, %c0_23], %25 {strides = array<i32>} : memref<16x512xf32, #tpu.memory_space<vmem>>, vector<16x512xf32>,
    %c0_24 = arith.constant 0 : index
    %c0_25 = arith.constant 0 : index
    %c0_26 = arith.constant 0 : index
    %c0_27 = arith.constant 0 : index
    %27 = vector.load %arg2[%c0_24, %c0_25, %c0_26, %c0_27] : memref<1x1x8x520xf32, #tpu.memory_space<vmem>>, vector<1x1x8x512xf32>
    %28 = vector.shape_cast %27 : vector<1x1x8x512xf32> to vector<8x512xf32>
    %c1 = arith.constant 1 : index
    %c0_28 = arith.constant 0 : index
    %c0_29 = arith.constant 0 : index
    %29 = vector.load %arg3[%c1, %c0_28, %c0_29] : memref<2x16x40xf32, #tpu.memory_space<vmem>>, vector<1x16x8xf32>
    %30 = vector.shape_cast %29 : vector<1x16x8xf32> to vector<16x8xf32>
    %cst_30 = arith.constant dense<0.000000e+00> : vector<16x512xf32>
    %31 = tpu.matmul %30, %28, %cst_30 {dimension_numbers = #tpu.dot_dimension_numbers<[1], [0], [0], [1], [0, 0, 1, 1], [], []>} : vector<16x8xf32>, vector<8x512xf32>, vector<16x512xf32> -> vector<16x512xf32>
    %c0_31 = arith.constant 0 : index
    %c0_32 = arith.constant 0 : index
    %c0_33 = arith.constant 0 : index
    %c2 = arith.constant 2 : index
    %32 = vector.load %arg2[%c0_31, %c0_32, %c0_33, %c2] : memref<1x1x8x520xf32, #tpu.memory_space<vmem>>, vector<1x1x8x512xf32>
    %33 = vector.shape_cast %32 : vector<1x1x8x512xf32> to vector<8x512xf32>
    %c1_34 = arith.constant 1 : index
    %c0_35 = arith.constant 0 : index
    %c8_36 = arith.constant 8 : index
    %34 = vector.load %arg3[%c1_34, %c0_35, %c8_36] : memref<2x16x40xf32, #tpu.memory_space<vmem>>, vector<1x16x8xf32>
    %35 = vector.shape_cast %34 : vector<1x16x8xf32> to vector<16x8xf32>
    %cst_37 = arith.constant dense<0.000000e+00> : vector<16x512xf32>
    %36 = tpu.matmul %35, %33, %cst_37 {dimension_numbers = #tpu.dot_dimension_numbers<[1], [0], [0], [1], [0, 0, 1, 1], [], []>} : vector<16x8xf32>, vector<8x512xf32>, vector<16x512xf32> -> vector<16x512xf32>
    %37 = arith.addf %31, %36 : vector<16x512xf32>
    %c0_38 = arith.constant 0 : index
    %c0_39 = arith.constant 0 : index
    %c0_40 = arith.constant 0 : index
    %c4_41 = arith.constant 4 : index
    %38 = vector.load %arg2[%c0_38, %c0_39, %c0_40, %c4_41] : memref<1x1x8x520xf32, #tpu.memory_space<vmem>>, vector<1x1x8x512xf32>
    %39 = vector.shape_cast %38 : vector<1x1x8x512xf32> to vector<8x512xf32>
    %c1_42 = arith.constant 1 : index
    %c0_43 = arith.constant 0 : index
    %c16_44 = arith.constant 16 : index
    %40 = vector.load %arg3[%c1_42, %c0_43, %c16_44] : memref<2x16x40xf32, #tpu.memory_space<vmem>>, vector<1x16x8xf32>
    %41 = vector.shape_cast %40 : vector<1x16x8xf32> to vector<16x8xf32>
    %cst_45 = arith.constant dense<0.000000e+00> : vector<16x512xf32>
    %42 = tpu.matmul %41, %39, %cst_45 {dimension_numbers = #tpu.dot_dimension_numbers<[1], [0], [0], [1], [0, 0, 1, 1], [], []>} : vector<16x8xf32>, vector<8x512xf32>, vector<16x512xf32> -> vector<16x512xf32>
    %43 = arith.addf %37, %42 : vector<16x512xf32>
    %c0_46 = arith.constant 0 : index
    %c0_47 = arith.constant 0 : index
    %c0_48 = arith.constant 0 : index
    %c6 = arith.constant 6 : index
    %44 = vector.load %arg2[%c0_46, %c0_47, %c0_48, %c6] : memref<1x1x8x520xf32, #tpu.memory_space<vmem>>, vector<1x1x8x512xf32>
    %45 = vector.shape_cast %44 : vector<1x1x8x512xf32> to vector<8x512xf32>
    %c1_49 = arith.constant 1 : index
    %c0_50 = arith.constant 0 : index
    %c24 = arith.constant 24 : index
    %46 = vector.load %arg3[%c1_49, %c0_50, %c24] : memref<2x16x40xf32, #tpu.memory_space<vmem>>, vector<1x16x8xf32>
    %47 = vector.shape_cast %46 : vector<1x16x8xf32> to vector<16x8xf32>
    %cst_51 = arith.constant dense<0.000000e+00> : vector<16x512xf32>
    %48 = tpu.matmul %47, %45, %cst_51 {dimension_numbers = #tpu.dot_dimension_numbers<[1], [0], [0], [1], [0, 0, 1, 1], [], []>} : vector<16x8xf32>, vector<8x512xf32>, vector<16x512xf32> -> vector<16x512xf32>
    %49 = arith.addf %43, %48 : vector<16x512xf32>
    %c0_52 = arith.constant 0 : index
    %c0_53 = arith.constant 0 : index
    %c0_54 = arith.constant 0 : index
    %c8_55 = arith.constant 8 : index
    %50 = vector.load %arg2[%c0_52, %c0_53, %c0_54, %c8_55] : memref<1x1x8x520xf32, #tpu.memory_space<vmem>>, vector<1x1x8x512xf32>
    %51 = vector.shape_cast %50 : vector<1x1x8x512xf32> to vector<8x512xf32>
    %c1_56 = arith.constant 1 : index
    %c0_57 = arith.constant 0 : index
    %c32 = arith.constant 32 : index
    %52 = vector.load %arg3[%c1_56, %c0_57, %c32] : memref<2x16x40xf32, #tpu.memory_space<vmem>>, vector<1x16x8xf32>
    %53 = vector.shape_cast %52 : vector<1x16x8xf32> to vector<16x8xf32>
    %cst_58 = arith.constant dense<0.000000e+00> : vector<16x512xf32>
    %54 = tpu.matmul %53, %51, %cst_58 {dimension_numbers = #tpu.dot_dimension_numbers<[1], [0], [0], [1], [0, 0, 1, 1], [], []>} : vector<16x8xf32>, vector<8x512xf32>, vector<16x512xf32> -> vector<16x512xf32>
    %55 = arith.addf %49, %54 : vector<16x512xf32>
    %c1_59 = arith.constant 1 : index
    %c0_60 = arith.constant 0 : index
    %c0_61 = arith.constant 0 : index
    %56 = vector.load %arg4[%c1_59, %c0_60, %c0_61] : memref<2x16x1xf32, #tpu.memory_space<vmem>>, vector<1x16x1xf32>
    %57 = vector.shape_cast %56 : vector<1x16x1xf32> to vector<16x1xf32>
    %58 = vector.broadcast %57 : vector<16x1xf32> to vector<16x512xf32>
    %59 = arith.addf %55, %58 : vector<16x512xf32>
    %cst_62 = arith.constant 0.000000e+00 : f32
    %60 = vector.broadcast %cst_62 : f32 to vector<16x512xf32>
    %61 = arith.cmpf oge, %59, %60 : vector<16x512xf32>
    %cst_63 = arith.constant 2.000000e-01 : f32
    %62 = vector.broadcast %cst_63 : f32 to vector<16x512xf32>
    %63 = arith.mulf %62, %59 : vector<16x512xf32>
    %64 = arith.select %61, %59, %63 : vector<16x512xi1>, vector<16x512xf32>
    %c0_64 = arith.constant 0 : index
    %c0_65 = arith.constant 0 : index
    %65 = vector.load %arg6[%c0_64, %c0_65] : memref<16x512xf32, #tpu.memory_space<vmem>>, vector<16x512xf32>
    %66 = arith.addf %65, %64 : vector<16x512xf32>
    %c0_66 = arith.constant 0 : index
    %c0_67 = arith.constant 0 : index
    %c0_68 = arith.constant 0 : index
    %67 = vector.load %arg5[%c0_66, %c0_67, %c0_68] : memref<1x16x512xf32, #tpu.memory_space<vmem>>, vector<1x16x512xf32>
    %68 = vector.shape_cast %67 : vector<1x16x512xf32> to vector<16x512xf32>
    %69 = vector.shape_cast %66 : vector<16x512xf32> to vector<1x16x512xf32>
    tpu.vector_store %arg5[%c0_66, %c0_67, %c0_68], %69 {strides = array<i32>} : memref<1x16x512xf32, #tpu.memory_space<vmem>>, vector<1x16x512xf32>,
    return
  }
  func.func @transform_0(%arg0: i32, %arg1: i32) -> (i32, i32, i32, i32) {
    %c2_i32 = arith.constant 2 : i32
    %0 = arith.muli %arg0, %c2_i32 : i32
    %1 = arith.addi %0, %arg1 : i32
    %c0_i32 = arith.constant 0 : i32
    %c0_i32_0 = arith.constant 0 : i32
    %c0_i32_1 = arith.constant 0 : i32
    %c0_i32_2 = arith.constant 0 : i32
    return %1, %c0_i32, %c0_i32_0, %c0_i32_1 : i32, i32, i32, i32
  }
  func.func @transform_1(%arg0: i32, %arg1: i32) -> (i32, i32, i32) {
    %c0_i32 = arith.constant 0 : i32
    %c0_i32_0 = arith.constant 0 : i32
    %c0_i32_1 = arith.constant 0 : i32
    %c0_i32_2 = arith.constant 0 : i32
    return %c0_i32, %c0_i32_0, %c0_i32_1 : i32, i32, i32
  }
  func.func @transform_2(%arg0: i32, %arg1: i32) -> (i32, i32, i32) {
    %c0_i32 = arith.constant 0 : i32
    %c0_i32_0 = arith.constant 0 : i32
    %c0_i32_1 = arith.constant 0 : i32
    %c0_i32_2 = arith.constant 0 : i32
    return %c0_i32, %c0_i32_0, %c0_i32_1 : i32, i32, i32
  }
  func.func @transform_3(%arg0: i32, %arg1: i32) -> (i32, i32, i32) {
    %c0_i32 = arith.constant 0 : i32
    %c0_i32_0 = arith.constant 0 : i32
    return %arg0, %c0_i32, %arg1 : i32, i32, i32
  }
}

</mosaic_0001>

<bundles_post_ra>
// kernel: tpu_custom_call.1
= control target key start
LH: loop header
LB: loop body
LE: loop exit
PB: predicated region body
PF: predicated region fallthrough
CT: control target
= control target key end

     0   :  { %8 = vsyncpa [#allocation4], 0  ;;  %s2797_s0 = inlined_call_operand.hbm [shape: f32[4,1,8,520], index: 0, kind: input, shape index: {}]   ;;  %s2798_s1 = inlined_call_operand.vmem [shape: f32[2,16,40], index: 1, kind: input, shape index: {}]   ;;  %s2799_s2 = inlined_call_operand.vmem [shape: f32[2,16,1], index: 2, kind: input, shape index: {}]   ;;  %s2800_s3 = inlined_call_operand.hbm [shape: f32[2,16,1024], index: 3, kind: output, shape index: {}]  }
   0x1   :  { %10 = vsyncpa [#allocation4 + $0x1], 0 }
   0x2   :  { %11 = vsyncpa [#allocation5], 0 }
   0x3   :  { %13 = vsyncpa [#allocation5 + $0x1], 0  ;;  %s2329_s12 = smov 0   ;;  %s2331_s13 = smov 0  }
   0x4   :  { %s2333_s14 = smov 0   ;;  %s2335_s15 = smov 0  }
   0x5   :  { %s2337_s16 = smov 0   ;;  %s2339_s17 = smov 0  }
   0x6   :  { %s2341_s18 = smov 0   ;;  %s2343_s19 = smov 0  }
   0x7   :  { %s2345_s20 = smov 0   ;;  %s2347_s21 = smov 0  }
   0x8   :  { %s2349_s22 = smov 0  }
   0x9 LB: > { %2805 = sst [smem:[#allocation9_spill]] %s2287_s21  ;;  %s1918_s23 = sadd.s32 4294967295, %s2291_s22   ;;  %s2291_s22 = sphi %s2349_s22, %s19_s22   ;;  %s2287_s21 = sphi %s2347_s21, %s2819_s21   ;;  %s2283_s20 = sphi %s2345_s20, %s2827_s20   ;;  %s2279_s19 = sphi %s2343_s19, %s2817_s19   ;;  %s2275_s18 = sphi %s2341_s18, %s2826_s18   ;;  %s2271_s17 = sphi %s2339_s17, %s2825_s17   ;;  %s2267_s16 = sphi %s2337_s16, %s2824_s16   ;;  %s2263_s15 = sphi %s2335_s15, %s2823_s15   ;;  %s2259_s14 = sphi %s2333_s14, %s2822_s14   ;;  %s2255_s13 = sphi %s2331_s13, %s2821_s13   ;;  %s2251_s12 = sphi %s2329_s12, %s2820_s12  }
   0xa   : > { %s1919_s24 = sadd.s32 4294967294, %s2291_s22   ;;  %s28_s25 = sadd.s32 1, %s2283_s20 }
   0xb   : > { %s31_s26 = sadd.s32 1, %s2287_s21  ;;  %p29_p0 = scmp.ge.s32.totalorder %s28_s25, 2 }
   0xc   : > { %s1920_s27 = sshll.u32 %s2287_s21, 1  ;;  %s42_s29 = sadd.s32 1, %s2271_s17 }
   0xd   : > { %s2388_s28 = sadd.s32 %s2283_s20, %s1920_s27  ;;  %s2829_s25 = smov (%p29_p0, %s28_s25), 0 }
   0xe   : > { %2806 = sst [smem:[#allocation10_spill]] %s2829_s25  ;;  %s2831_s26 = smov (!%p29_p0, %s31_s26), %s2287_s21 }
   0xf   : > { %p49_p1 = scmp.ne.s32.totalorder %s2271_s17, %s2267_s16  ;;  %p50_p2 = scmp.eq.s32.totalorder %s2291_s22, 0 }
  0x10   : > { %p33_p3 = scmp.ge.s32.totalorder %s2831_s26, 2  ;;  %p55_p4 = scmp.ne.s32.totalorder %s2267_s16, %s2263_s15 }
  0x11   : > { %p2398_p5 = por %p50_p2, %p49_p1  ;;  %p56_p6 = scmp.eq.s32.totalorder %s1918_s23, 0 }
  0x12   : > { %s2833_s26 = smov (%p33_p3, %s2831_s26), 0  ;;  %s108_s5 = ssub.s32 %s2283_s20, %s2829_s25 }
  0x13   : > { %2808 = sst [smem:[#allocation11_spill]] %s2833_s26  ;;  %p2406_p7 = por %p56_p6, %p55_p4 }
  0x14   : > { %s1921_s6 = sshll.u32 %s2833_s26, 1  ;;  %s107_s7 = ssub.s32 %s2287_s21, %s2833_s26 }
  0x15   : > { %s38_s8 = sadd.s32 %s1921_s6, %s2829_s25  ;;  %s109_s9 = sor.u32 %s108_s5, %s107_s7 }
  0x16   : > { %s39_s10 = ssub.s32 %s2388_s28, %s38_s8  ;;  %p110_p8 = scmp.eq.s32.totalorder %s109_s9, 0 }
  0x17   : > { %p40_p9 = scmp.eq.s32.totalorder %s39_s10, 0  ;;  %s112_s11 = sadd.s32 1, %s2259_s14 }
  0x18   : > { %s2419_s15 = scalar_select %p110_p8, %s2259_s14, %s112_s11  }
  0x19   : > { %s2422_s27 = scalar_select %p40_p9, %s2271_s17, %s42_s29  }
  0x1a   : > { %p122_p10 = scmp.ne.s32.totalorder %s2259_s14, %s2255_s13  ;;  %p123_p11 = scmp.eq.s32.totalorder %s1918_s23, 3 }
  0x1b   : > { %p128_p12 = scmp.ne.s32.totalorder %s2255_s13, %s2251_s12  ;;  %p129_p13 = scmp.eq.s32.totalorder %s1919_s24, 3 }
  0x1c   : > { %p2432_p0 = por %p123_p11, %p122_p10  ;;  %p2033_p2 = scmp.lt.s32.totalorder %s2291_s22, 4 }
  0x1d   : > { %p2436_p1 = por %p129_p13, %p128_p12  ;;  %s155_s7 = sand.u32 1, %s2271_s17  }
  0x1e   : > { %s2810_s6 = scalar_select %p2432_p0, 1, 0 }
  0x1f   : > { %s2811_s5 = scalar_select %p2436_p1, 1, 0 }
  0x20   : > { %s2019_s8 = smul.u32 640, %s2388_s28  ;;  %p2450_p3 = pnand %p2033_p2, %p2398_p5 }
  0x21   : > { %s2018_s29 = smul.u32 40, %s155_s7  ;;  %s156_s9 = scalar_lea.sflag [#allocation4], %s155_s7 }
  0x22   : > { %s2446_s11 = scalar_lea.hbm %s2797_s0, %s2019_s8  ;;  %p2141_p9 = pneg %p2450_p3 }
  0x23   : > { %s159_s24 = scalar_lea.vmem [#allocation3], %s2018_s29  ;;  %s2139_s8 = scalar_lea.hbm %s2446_s11, 640 }
  0x24   : > { %s169_s28 = sshll.u32 %s159_s24, 4  ;;  %p2140_p8 = scmp.ne.s32.totalorder %s2446_s11, %s2139_s8  ;;  %s2455_s28 = int_to_ptr.vmem [resolvable:$true] %s169_s28 }
  0x25   : > { %s2144_s26 = scalar_lea.hbm %s2797_s0, 2560  ;;  %p2145_p11 = scmp.lt.u32.totalorder %s2446_s11, %s2797_s0 }
  0x26   : > { %p2142_p5 = pnand %p2141_p9, %p2140_p8  ;;  %p2146_p12 = scmp.lt.u32.totalorder %s2144_s26, %s2139_s8 }
  0x27   : > { %p2148_p2 = scmp.lt.u32.totalorder %s2139_s8, %s2446_s11 }
  0x28   : > { %p2143_p10 = pneg %p2142_p5  ;;  %p2147_p13 = por %p2146_p12, %p2145_p11 }
  0x2a   : > { %p2149_p4 = por %p2148_p2, %p2147_p13 }
  0x2c   : > { %p2150_p6 = pnand %p2149_p4, %p2143_p10 }
  0x2e   : > { %2153 = shalt.err (!%p2150_p6)
}
  0x2f   : > { %s2154_s7 = scalar_lea.vmem %s2455_s28, 640  ;;  %s2293_s29 = smov [#allocation3]  }
  0x30   : > { %p2155_p8 = scmp.ne.s32.totalorder %s2455_s28, %s2154_s7  ;;  %s2159_s24 = sshll.u32 %s2293_s29, 4  ;;  %s2160_s24 = int_to_ptr.vmem [resolvable:$false] %s2159_s24 }
  0x31   : > { %s2161_s21 = scalar_lea.vmem %s2160_s24, 1280  ;;  %p2162_p0 = scmp.lt.s32.totalorder %s2455_s28, %s2160_s24 }
  0x32   : > { %p2157_p5 = pnand %p2155_p8, %p2141_p9  ;;  %p2163_p11 = scmp.lt.s32.totalorder %s2161_s21, %s2154_s7 }
  0x34   : > { %p2158_p1 = pneg %p2157_p5  ;;  %p2164_p12 = por %p2163_p11, %p2162_p0 }
  0x36   : > { %p2165_p13 = pnand %p2164_p12, %p2158_p1 }
  0x38   : > { %2168 = shalt.err (!%p2165_p13)
}
  0x39   : > { %2028 = dma.hbm_to_vmem [thread:$0]  (!%p2450_p3), %s2446_s11, 640, %s2455_s28, %s156_s9  }
  0x3a   : > { %p2813_p4 = scmp.lt.s32.totalorder %s2291_s22, 5  ;;  %p2814_p6 = scmp.ge.s32.totalorder %s2291_s22, 1 }
  0x3c   : > { %p175_p9 = pnand %p2814_p6, %p2813_p4 }
  0x3d   : > { %s180_s25 = sand.u32 (!%p175_p9), 1, %s2267_s16  }
  0x3e   : > { %178 = sbr.rel (%p175_p9) target bundleno = 518 (0x206), region = 32  ;;  %s181_s8 = scalar_lea.sflag (!%p175_p9), [#allocation4], %s180_s25 }
  0x3f   : > { %s2020_s26 = smul.u32 (!%p175_p9), 40, %s180_s25 }
  0x41   : > { %s184_s30 = scalar_lea.vmem (!%p175_p9), [#allocation3], %s2020_s26 }
  0x45   : > { %2242 = dma.done.wait (%p2406_p7), %s181_s8, 640  }
  0x46   : > { %2244 = vsyncadd (%p2406_p7), %s181_s8, 4294966656  ;;  %v2294_v0 = vmov 0.0   ;;  %v2494_v1 = vld [vmem:[%s184_s30 + $0x18] sm:$0xff]  ;;  %v2496_v2 = vld [vmem:[%s184_s30 + $0x8] sm:$0xff]  ;;  %s2295_s11 = smov 124   ;;  %s2296_s28 = smov 120  }
  0x47   : > { %393 = vmatprep.mubr.f32.mxu1 %v2294_v0  ;;  %316 = vmatprep.mubr.f32.mxu0 %v2294_v0  ;;  %v214_v3 = vld [vmem:[%s184_s30 + $0x20] sm:$0xff]  ;;  %v2502_v4 = vld [vmem:[%s184_s30 + $0x10] sm:$0xff]  ;;  %s2297_s7 = smov 125   ;;  %s2298_s29 = smov 123   ;;  %v2303_v10 = vmov 0   ;;  %vm238_vm0 = vcmask 1014784  }
  0x48   : > { %234 = vrot.lane.b32.xlu1 %v2494_v1, %s2295_s11  ;;  %230 = vrot.lane.b32.xlu0 %v2496_v2, %s2295_s11  ;;  %v2510_v5 = vld [vmem:[%s2798_s1] sm:$0xff]  ;;  %v2521_v7 = vld [vmem:[%s2798_s1 + $0x8] sm:$0xff]  ;;  %s2299_s24 = smov 112   ;;  %s2300_s21 = smov 126   ;;  %vm247_vm1 = vcmask 64512   ;;  %vm416_vm2 = vcmask 1022976  }
  0x49   : > { %v2512_v6 = vld [vmem:[%s184_s30] sm:$0xff]  ;;  %v2542_v8 = vld [vmem:[%s2798_s1 + $0x18] sm:$0xff]  ;;  %v2547_v9 = vld [vmem:[%s2798_s1 + $0x10] sm:$0xff]  ;;  %s2301_s4 = smov 122   ;;  %s2302_s23 = smov 104   ;;  %2137 = vset.pattern.permute.xlu1 %v2303_v10  ;;  %2138 = vset.pattern.permute.xlu0 %v2303_v10  ;;  %vm597_vm3 = vcmask 1006592  }
  0x4a   : > { %v772_v11 = vld [vmem:[%s2799_s2] sm:$0xff]  ;;  %v773_v12 = vld [vmem:[%s2799_s2 + $0x8] sm:$0xff]  ;;  %v1962_v13 = vld [vmem:[%s2799_s2 + $0x10] sm:$0xff]  ;;  %vm853_vm4 = vcmask 1031168   ;;  %vm1380_vm5 = vcmask 998400   ;;  %vm1569_vm6 = vcmask 982016  }
  0x4b   : > { %v1963_v14 = vld [vmem:[%s2799_s2 + $0x18] sm:$0xff]  ;;  %s1965_s30 = sshll.u32 %s2275_s18, 2  ;;  %p2815_p0 = scmp.ne.s32.totalorder %s2810_s6, 0 }
  0x4c   : > { %236 = vrot.lane.b32.xlu1 %v214_v3, %s2295_s11  ;;  %232 = vrot.lane.b32.xlu0 %v2502_v4, %s2295_s11 }
  0x50   : > { %219 = vrot.lane.b32.xlu1 %v2510_v5, %s2296_s28  ;;  %228 = vrot.lane.b32.xlu0 %v2512_v6, %s2295_s11 }
  0x54   : > { %408 = vrot.lane.b32.xlu1 %v2496_v2, %s2297_s7  ;;  %221 = vrot.lane.b32.xlu0 %v2521_v7, %s2296_s28 }
  0x58   : > { %412 = vrot.lane.b32.xlu1 %v2494_v1, %s2297_s7  ;;  %410 = vrot.lane.b32.xlu0 %v2502_v4, %s2297_s7 }
  0x5c   : > { %406 = vrot.lane.b32.xlu1 %v2512_v6, %s2297_s7  ;;  %414 = vrot.lane.b32.xlu0 %v214_v3, %s2297_s7 }
  0x60   : > { %591 = vrot.lane.b32.xlu1 %v2502_v4, %s2298_s29  ;;  %589 = vrot.lane.b32.xlu0 %v2496_v2, %s2298_s29 }
  0x64   : > { %595 = vrot.lane.b32.xlu1 %v214_v3, %s2298_s29  ;;  %593 = vrot.lane.b32.xlu0 %v2494_v1, %s2298_s29 }
  0x68   : > { %583 = vrot.lane.b32.xlu1 %v2510_v5, %s2299_s24  ;;  %587 = vrot.lane.b32.xlu0 %v2512_v6, %s2298_s29 }
  0x6c   : > { %845 = vrot.lane.b32.xlu1 %v2496_v2, %s2300_s21  ;;  %585 = vrot.lane.b32.xlu0 %v2521_v7, %s2299_s24 }
  0x70   : > { %849 = vrot.lane.b32.xlu1 %v2494_v1, %s2300_s21  ;;  %847 = vrot.lane.b32.xlu0 %v2502_v4, %s2300_s21 }
  0x74   : > { %843 = vrot.lane.b32.xlu1 %v2512_v6, %s2300_s21  ;;  %851 = vrot.lane.b32.xlu0 %v214_v3, %s2300_s21  ;;  %s2305_s21 = smov [#allocation6]  }
  0x75   : > { %s2173_s25 = sshll.u32 %s2305_s21, 4  ;;  %s2174_s25 = int_to_ptr.vmem [resolvable:$false] %s2173_s25 }
  0x76   : > { %s2175_s26 = scalar_lea.vmem %s2174_s25, 2048 }
  0x78   : > { %836 = vrot.lane.b32.xlu1 %v2542_v8, %s2296_s28  ;;  %834 = vrot.lane.b32.xlu0 %v2547_v9, %s2296_s28 }
  0x7c   : > { %1186 = vrot.lane.b32.xlu1 %v2502_v4, %s2295_s11  ;;  %1184 = vrot.lane.b32.xlu0 %v2496_v2, %s2295_s11 }
  0x80   : > { %1190 = vrot.lane.b32.xlu1 %v214_v3, %s2295_s11  ;;  %1188 = vrot.lane.b32.xlu0 %v2494_v1, %s2295_s11 }
  0x84   : > { %1178 = vrot.lane.b32.xlu1 %v2547_v9, %s2299_s24  ;;  %1182 = vrot.lane.b32.xlu0 %v2512_v6, %s2295_s11  ;;  %s2304_s11 = smov 96  }
  0x88   : > { %1372 = vrot.lane.b32.xlu1 %v2496_v2, %s2301_s4  ;;  %1180 = vrot.lane.b32.xlu0 %v2542_v8, %s2299_s24 }
  0x8c   : > { %1376 = vrot.lane.b32.xlu1 %v2494_v1, %s2301_s4  ;;  %1374 = vrot.lane.b32.xlu0 %v2502_v4, %s2301_s4 }
  0x90   : > { %1370 = vrot.lane.b32.xlu1 %v2512_v6, %s2301_s4  ;;  %1378 = vrot.lane.b32.xlu0 %v214_v3, %s2301_s4  ;;  %s1966_s4 = sshll.u32 %s2279_s19, 4 }
  0x91   : > { %s2702_s18 = sadd.s32 %s1966_s4, %s1965_s30 }
  0x94   : > { %1368 = vrot.lane.b32.xlu1 %v2542_v8, %s2302_s23  ;;  %1366 = vrot.lane.b32.xlu0 %v2547_v9, %s2302_s23 }
  0x98   : > { %1563 = vrot.lane.b32.xlu1 %v2502_v4, %s2296_s28  ;;  %1561 = vrot.lane.b32.xlu0 %v2496_v2, %s2296_s28 }
  0x9c   : > { %1567 = vrot.lane.b32.xlu1 %v214_v3, %s2296_s28  ;;  %1565 = vrot.lane.b32.xlu0 %v2494_v1, %s2296_s28 }
  0xa0   : > { %1555 = vrot.lane.b32.xlu1 %v2547_v9, %s2304_s11  ;;  %1559 = vrot.lane.b32.xlu0 %v2512_v6, %s2296_s28  ;;  %s204_s28 = sand.u32 1, %s2255_s13  }
  0xa1   : > { %s2693_s8 = sshll.u32 %s204_s28, 6  ;;  %s2736_s29 = scalar_lea.sflag [#allocation5], %s204_s28 }
  0xa2   : > { %s2705_s23 = scalar_lea.vmem [#allocation6], %s2693_s8 }
  0xa3   : > { %s1829_s19 = sshll.u32 %s2705_s23, 4  ;;  %s2720_s19 = int_to_ptr.vmem [resolvable:$true] %s1829_s19 }
  0xa4   : > { %1557 = vrot.lane.b32.xlu0 %v2542_v8, %s2304_s11  ;;  %776 = vperm.xlu1 %2137, %v772_v11   ;;  %s1967_s11 = sshll.u32 %s2702_s18, 7  ;;  %s2169_s24 = scalar_lea.vmem %s2720_s19, 1024 }
  0xa5   : > { %s2729_s7 = scalar_lea.hbm %s2800_s3, %s1967_s11  ;;  %p2170_p7 = scmp.ne.s32.totalorder %s2720_s19, %s2169_s24 }
  0xa6   : > { %p2176_p10 = scmp.lt.s32.totalorder %s2720_s19, %s2174_s25  ;;  %p2177_p2 = scmp.lt.s32.totalorder %s2175_s26, %s2169_s24 }
  0xa7   : > { %p2171_p1 = pnand %p2170_p7, %p2815_p0 }
  0xa8   : > { %781 = vperm.xlu0 %2138, %v773_v12   ;;  %1749 = vperm.xlu1 %2137, %v1962_v13   ;;  %p2178_p8 = por %p2177_p2, %p2176_p10 }
  0xa9   : > { %p2172_p3 = pneg %p2171_p1 }
  0xab   : > { %p2179_p5 = pnand %p2178_p8, %p2172_p3 }
  0xac   : > { %1754 = vperm.xlu1 %2137, %v1963_v14  }
  0xba   : > { %v235_v15 = vpop.permute.xlu1 %234  ;;  %v231_v16 = vpop.permute.xlu0 %230 }
  0xbe   : > { %v237_v17 = vpop.permute.xlu1 %236  ;;  %v233_v18 = vpop.permute.xlu0 %232 }
  0xbf   : > { %v240_v19 = vsel %vm238_vm0, %v231_v16, %v233_v18  ;;  %v242_v20 = vsel %vm238_vm0, %v235_v15, %v237_v17  ;;  %v241_v21 = vsel %vm238_vm0, %v233_v18, %v235_v15 }
  0xc0   : > { %252 = vmatprep.subr.mxu0 %v240_v19  ;;  %329 = vmatprep.subr.mxu1 %v242_v20 }
  0xc1   : > { %330 = vmatpush1.msra.mxu1 %v241_v21 }
  0xc2   : > { %v220_v22 = vpop.permute.xlu1 %219  ;;  %v229_v23 = vpop.permute.xlu0 %228 }
  0xc3   : > { %1930 = vmatmul.mubr.msk.f32.vlgmr.msra.gmra.mrb[0].mxu1 %vm247_vm1, %v220_v22  ;;  %v239_v24 = vsel %vm238_vm0, %v229_v23, %v231_v16 }
  0xc4   : > { %253 = vmatpush1.msra.mxu0 %v239_v24  ;;  %399 = vmatprep.mubr.f32.mxu1 %v2294_v0 }
  0xc5   : > { %1928 = vmatmul.mubr.msk.f32.vlgmr.msra.gmra.mrb[0].mxu0 %vm247_vm1, %v220_v22 }
  0xc6   : > { %v409_v25 = vpop.permute.xlu1 %408  ;;  %v222_v26 = vpop.permute.xlu0 %221  ;;  %322 = vmatprep.mubr.f32.mxu0 %v2294_v0 }
  0xc7   : > { %1931 = vmatmul.mubr.msk.f32.gmra.mrb[2].mxu1 %vm247_vm1, %v222_v26 }
  0xc8   : > { %570 = vmatprep.mubr.f32.mxu1 %v2294_v0 }
  0xc9   : > { %1929 = vmatmul.mubr.msk.f32.gmra.mrb[2].mxu0 %vm247_vm1, %v222_v26 }
  0xca   : > { %v413_v27 = vpop.permute.xlu1 %412  ;;  %v411_v28 = vpop.permute.xlu0 %410  ;;  %493 = vmatprep.mubr.f32.mxu0 %v2294_v0 }
  0xcb   : > { %v418_v29 = vsel %vm416_vm2, %v409_v25, %v411_v28  ;;  %v419_v34 = vsel %vm416_vm2, %v411_v28, %v413_v27 }
  0xcc   : > { %429 = vmatprep.subr.mxu0 %v418_v29 }
  0xce   : > { %v407_v30 = vpop.permute.xlu1 %406  ;;  %v415_v31 = vpop.permute.xlu0 %414 }
  0xcf   : > { %v417_v32 = vsel %vm416_vm2, %v407_v30, %v409_v25  ;;  %v420_v33 = vsel %vm416_vm2, %v413_v27, %v415_v31 }
  0xd0   : > { %430 = vmatpush1.msra.mxu0 %v417_v32  ;;  %506 = vmatprep.subr.mxu1 %v420_v33 }
  0xd1   : > { %507 = vmatpush1.msra.mxu1 %v419_v34  ;;  %1932 = vmatmul.mubr.msk.f32.vlgmr.msra.gmra.mrb[0].mxu0 %vm247_vm1, %v2510_v5 }
  0xd2   : > { %v592_v35 = vpop.permute.xlu1 %591  ;;  %v590_v36 = vpop.permute.xlu0 %589  ;;  %1934 = vmatmul.mubr.msk.f32.vlgmr.msra.gmra.mrb[0].mxu1 %vm247_vm1, %v2510_v5  ;;  %499 = vmatprep.mubr.f32.mxu0 %v2294_v0 }
  0xd3   : > { %v599_v37 = vsel %vm597_vm3, %v590_v36, %v592_v35  ;;  %576 = vmatprep.mubr.f32.mxu1 %v2294_v0 }
  0xd4   : > { %610 = vmatprep.subr.mxu0 %v599_v37 }
  0xd5   : > { %1933 = vmatmul.mubr.msk.f32.gmra.mrb[2].mxu0 %vm247_vm1, %v2521_v7 }
  0xd6   : > { %v596_v38 = vpop.permute.xlu1 %595  ;;  %v594_v39 = vpop.permute.xlu0 %593  ;;  %1935 = vmatmul.mubr.msk.f32.gmra.mrb[2].mxu1 %vm247_vm1, %v2521_v7  ;;  %674 = vmatprep.mubr.f32.mxu0 %v2294_v0 }
  0xd7   : > { %v600_v40 = vsel %vm597_vm3, %v592_v35, %v594_v39  ;;  %v601_v41 = vsel %vm597_vm3, %v594_v39, %v596_v38  ;;  %751 = vmatprep.mubr.f32.mxu1 %v2294_v0 }
  0xd8   : > { %687 = vmatprep.subr.mxu1 %v601_v41 }
  0xd9   : > { %688 = vmatpush1.msra.mxu1 %v600_v40 }
  0xda   : > { %v584_v42 = vpop.permute.xlu1 %583  ;;  %v588_v43 = vpop.permute.xlu0 %587 }
  0xdb   : > { %v598_v44 = vsel %vm597_vm3, %v588_v43, %v590_v36  ;;  %1938 = vmatmul.mubr.msk.f32.vlgmr.msra.gmra.mrb[0].mxu1 %vm247_vm1, %v584_v42 }
  0xdc   : > { %611 = vmatpush1.msra.mxu0 %v598_v44  ;;  %757 = vmatprep.mubr.f32.mxu1 %v2294_v0 }
  0xdd   : > { %1936 = vmatmul.mubr.msk.f32.vlgmr.msra.gmra.mrb[0].mxu0 %vm247_vm1, %v584_v42 }
  0xde   : > { %v846_v45 = vpop.permute.xlu1 %845  ;;  %v586_v46 = vpop.permute.xlu0 %585  ;;  %680 = vmatprep.mubr.f32.mxu0 %v2294_v0 }
  0xdf   : > { %1939 = vmatmul.mubr.msk.f32.gmra.mrb[2].mxu1 %vm247_vm1, %v586_v46 }
  0xe0   : > { %1007 = vmatprep.mubr.f32.mxu1 %v2294_v0 }
  0xe1   : > { %1937 = vmatmul.mubr.msk.f32.gmra.mrb[2].mxu0 %vm247_vm1, %v586_v46 }
  0xe2   : > { %v850_v47 = vpop.permute.xlu1 %849  ;;  %v848_v48 = vpop.permute.xlu0 %847  ;;  %930 = vmatprep.mubr.f32.mxu0 %v2294_v0 }
  0xe3   : > { %v855_v49 = vsel %vm853_vm4, %v846_v45, %v848_v48  ;;  %v856_v54 = vsel %vm853_vm4, %v848_v48, %v850_v47 }
  0xe4   : > { %866 = vmatprep.subr.mxu0 %v855_v49 }
  0xe6   : > { %v844_v50 = vpop.permute.xlu1 %843  ;;  %v852_v51 = vpop.permute.xlu0 %851 }
  0xe7   : > { %v854_v52 = vsel %vm853_vm4, %v844_v50, %v846_v45  ;;  %v857_v53 = vsel %vm853_vm4, %v850_v47, %v852_v51 }
  0xe8   : > { %867 = vmatpush1.msra.mxu0 %v854_v52  ;;  %943 = vmatprep.subr.mxu1 %v857_v53 }
  0xe9   : > { %944 = vmatpush1.msra.mxu1 %v856_v54  ;;  %1024 = vmatprep.subr.mxu0 %v2496_v2 }
  0xea   : > { %v837_v55 = vpop.permute.xlu1 %836  ;;  %v835_v56 = vpop.permute.xlu0 %834  ;;  %1101 = vmatprep.subr.mxu1 %v2494_v1 }
  0xeb   : > { %1942 = vmatmul.mubr.msk.f32.vlgmr.msra.gmra.mrb[4].mxu0 %vm247_vm1, %v835_v56  ;;  %1944 = vmatmul.mubr.msk.f32.vlgmr.msra.gmra.mrb[4].mxu1 %vm247_vm1, %v835_v56 }
  0xec   : > { %936 = vmatprep.mubr.f32.mxu0 %v2294_v0  ;;  %1013 = vmatprep.mubr.f32.mxu1 %v2294_v0 }
  0xed   : > { %1025 = vmatpush1.msra.mxu0 %v2512_v6  ;;  %1102 = vmatpush1.msra.mxu1 %v2502_v4 }
  0xee   : > { %v1187_v57 = vpop.permute.xlu1 %1186  ;;  %v1185_v58 = vpop.permute.xlu0 %1184 }
  0xef   : > { %1943 = vmatmul.mubr.msk.f32.gmra.mrb[6].mxu0 %vm247_vm1, %v837_v55  ;;  %1945 = vmatmul.mubr.msk.f32.gmra.mrb[6].mxu1 %vm247_vm1, %v837_v55  ;;  %v1193_v59 = vsel %vm238_vm0, %v1185_v58, %v1187_v57 }
  0xf0   : > { %1204 = vmatprep.subr.mxu0 %v1193_v59  ;;  %1088 = vmatprep.mubr.f32.mxu0 %v2294_v0 }
  0xf1   : > { %1165 = vmatprep.mubr.f32.mxu1 %v2294_v0 }
  0xf2   : > { %v1191_v60 = vpop.permute.xlu1 %1190  ;;  %v1189_v61 = vpop.permute.xlu0 %1188 }
  0xf3   : > { %v1194_v62 = vsel %vm238_vm0, %v1187_v57, %v1189_v61  ;;  %1946 = vmatmul.mubr.msk.f32.vlgmr.msra.gmra.mrb[4].mxu0 %vm247_vm1, %v2547_v9  ;;  %1948 = vmatmul.mubr.msk.f32.vlgmr.msra.gmra.mrb[4].mxu1 %vm247_vm1, %v2547_v9  ;;  %v1195_v63 = vsel %vm238_vm0, %v1189_v61, %v1191_v60 }
  0xf4   : > { %1281 = vmatprep.subr.mxu1 %v1195_v63  ;;  %1094 = vmatprep.mubr.f32.mxu0 %v2294_v0 }
  0xf5   : > { %1282 = vmatpush1.msra.mxu1 %v1194_v62  ;;  %1171 = vmatprep.mubr.f32.mxu1 %v2294_v0 }
  0xf6   : > { %v1179_v1 = vpop.permute.xlu1 %1178  ;;  %v1183_v2 = vpop.permute.xlu0 %1182 }
  0xf7   : > { %v1192_v3 = vsel %vm238_vm0, %v1183_v2, %v1185_v58  ;;  %1947 = vmatmul.mubr.msk.f32.gmra.mrb[6].mxu0 %vm247_vm1, %v2542_v8  ;;  %1949 = vmatmul.mubr.msk.f32.gmra.mrb[6].mxu1 %vm247_vm1, %v2542_v8 }
  0xf8   : > { %1205 = vmatpush1.msra.mxu0 %v1192_v3  ;;  %1268 = vmatprep.mubr.f32.mxu0 %v2294_v0 }
  0xf9   : > { %1345 = vmatprep.mubr.f32.mxu1 %v2294_v0 }
  0xfa   : > { %v1373_v4 = vpop.permute.xlu1 %1372  ;;  %v1181_v5 = vpop.permute.xlu0 %1180 }
  0xfb   : > { %1950 = vmatmul.mubr.msk.f32.vlgmr.msra.gmra.mrb[4].mxu0 %vm247_vm1, %v1179_v1  ;;  %1952 = vmatmul.mubr.msk.f32.vlgmr.msra.gmra.mrb[4].mxu1 %vm247_vm1, %v1179_v1 }
  0xfc   : > { %1274 = vmatprep.mubr.f32.mxu0 %v2294_v0  ;;  %1351 = vmatprep.mubr.f32.mxu1 %v2294_v0 }
  0xfe   : > { %v1377_v6 = vpop.permute.xlu1 %1376  ;;  %v1375_v7 = vpop.permute.xlu0 %1374 }
  0xff   : > { %1951 = vmatmul.mubr.msk.f32.gmra.mrb[6].mxu0 %vm247_vm1, %v1181_v5  ;;  %1953 = vmatmul.mubr.msk.f32.gmra.mrb[6].mxu1 %vm247_vm1, %v1181_v5  ;;  %v1382_v8 = vsel %vm1380_vm5, %v1373_v4, %v1375_v7  ;;  %v1383_v13 = vsel %vm1380_vm5, %v1375_v7, %v1377_v6 }
 0x100   : > { %1393 = vmatprep.subr.mxu0 %v1382_v8  ;;  %1457 = vmatprep.mubr.f32.mxu0 %v2294_v0 }
 0x101   : > { %1534 = vmatprep.mubr.f32.mxu1 %v2294_v0 }
 0x102   : > { %v1371_v9 = vpop.permute.xlu1 %1370  ;;  %v1379_v10 = vpop.permute.xlu0 %1378 }
 0x103   : > { %v1381_v11 = vsel %vm1380_vm5, %v1371_v9, %v1373_v4  ;;  %v1384_v12 = vsel %vm1380_vm5, %v1377_v6, %v1379_v10 }
 0x104   : > { %1394 = vmatpush1.msra.mxu0 %v1381_v11  ;;  %1470 = vmatprep.subr.mxu1 %v1384_v12 }
 0x105   : > { %1471 = vmatpush1.msra.mxu1 %v1383_v13 }
 0x106   : > { %v1369_v14 = vpop.permute.xlu1 %1368  ;;  %v1367_v15 = vpop.permute.xlu0 %1366 }
 0x107   : > { %1954 = vmatmul.mubr.msk.f32.vlgmr.msra.gmra.mrb[4].mxu0 %vm247_vm1, %v1367_v15  ;;  %1956 = vmatmul.mubr.msk.f32.vlgmr.msra.gmra.mrb[4].mxu1 %vm247_vm1, %v1367_v15 }
 0x108   : > { %1463 = vmatprep.mubr.f32.mxu0 %v2294_v0  ;;  %1540 = vmatprep.mubr.f32.mxu1 %v2294_v0 }
 0x10a   : > { %v1564_v16 = vpop.permute.xlu1 %1563  ;;  %v1562_v17 = vpop.permute.xlu0 %1561 }
 0x10b   : > { %1955 = vmatmul.mubr.msk.f32.gmra.mrb[6].mxu0 %vm247_vm1, %v1369_v14  ;;  %1957 = vmatmul.mubr.msk.f32.gmra.mrb[6].mxu1 %vm247_vm1, %v1369_v14  ;;  %v1571_v18 = vsel %vm1569_vm6, %v1562_v17, %v1564_v16 }
 0x10c   : > { %1582 = vmatprep.subr.mxu0 %v1571_v18  ;;  %1723 = vmatprep.mubr.f32.mxu1 %v2294_v0 }
 0x10d   : > { %1646 = vmatprep.mubr.f32.mxu0 %v2294_v0 }
 0x10e   : > { %v1568_v19 = vpop.permute.xlu1 %1567  ;;  %v1566_v20 = vpop.permute.xlu0 %1565 }
 0x10f   : > { %v1572_v21 = vsel %vm1569_vm6, %v1564_v16, %v1566_v20  ;;  %v1573_v22 = vsel %vm1569_vm6, %v1566_v20, %v1568_v19 }
 0x110   : > { %1659 = vmatprep.subr.mxu1 %v1573_v22 }
 0x111   : > { %1660 = vmatpush1.msra.mxu1 %v1572_v21 }
 0x112   : > { %v1556_v23 = vpop.permute.xlu1 %1555  ;;  %v1560_v24 = vpop.permute.xlu0 %1559 }
 0x113   : > { %v1570_v25 = vsel %vm1569_vm6, %v1560_v24, %v1562_v17  ;;  %1960 = vmatmul.mubr.msk.f32.vlgmr.msra.gmra.mrb[4].mxu1 %vm247_vm1, %v1556_v23 }
 0x114   : > { %1583 = vmatpush1.msra.mxu0 %v1570_v25  ;;  %1729 = vmatprep.mubr.f32.mxu1 %v2294_v0 }
 0x115   : > { %1958 = vmatmul.mubr.msk.f32.vlgmr.msra.gmra.mrb[4].mxu0 %vm247_vm1, %v1556_v23 }
 0x116   : > { %v1558_v26 = vpop.permute.xlu0 %1557  ;;  %1652 = vmatprep.mubr.f32.mxu0 %v2294_v0 }
 0x117   : > { %1961 = vmatmul.mubr.msk.f32.gmra.mrb[6].mxu1 %vm247_vm1, %v1558_v26 }
 0x119   : > { %1959 = vmatmul.mubr.msk.f32.gmra.mrb[6].mxu0 %vm247_vm1, %v1558_v26 }
 0x123   : > { %v777_v35 = vpop.permute.xlu1 %776 }
 0x127   : > { %v782_v38 = vpop.permute.xlu0 %781  ;;  %v1750_v47 = vpop.permute.xlu1 %1749 }
 0x12b   : > { %v1755_v4 = vpop.permute.xlu1 %1754 }
 0x1ae   : > { %v753_v27 = vpop.f32.mrb[0].mxu1 }
 0x1af   : > { %v755_v28 = vpop.f32.mrb[1].mxu1  ;;  %v786_v36 = vadd.f32 %v777_v35, %v753_v27 }
 0x1b0   : > { %v676_v29 = vpop.f32.mrb[0].mxu0  ;;  %v787_v37 = vadd.f32 %v777_v35, %v755_v28 }
 0x1b1   : > { %v678_v30 = vpop.f32.mrb[1].mxu0  ;;  %v784_v39 = vadd.f32 %v777_v35, %v676_v29  ;;  %vm794_vm7 = vcmp.ge.f32.partialorder %v786_v36, 0.0  ;;  %v802_v41 = vmul.f32 0.2, %v786_v36 }
 0x1b2   : > { %v759_v31 = vpop.f32.mrb[2].mxu1  ;;  %v785_v40 = vadd.f32 %v777_v35, %v678_v30  ;;  %v803_v42 = vmul.f32 0.2, %v787_v37  ;;  %vm795_vm8 = vcmp.ge.f32.partialorder %v787_v37, 0.0 }
 0x1b3   : > { %v761_v32 = vpop.f32.mrb[3].mxu1  ;;  %v790_v0 = vadd.f32 %v782_v38, %v759_v31  ;;  %v800_v43 = vmul.f32 0.2, %v784_v39  ;;  %vm792_vm9 = vcmp.ge.f32.partialorder %v784_v39, 0.0  ;;  %v810_v49 = vsel %vm794_vm7, %v786_v36, %v802_v41 }
 0x1b4   : > { %v682_v33 = vpop.f32.mrb[2].mxu0  ;;  %v801_v44 = vmul.f32 0.2, %v785_v40  ;;  %v2683_v45 = vadd.f32 %v782_v38, %v761_v32  ;;  %vm793_vm10 = vcmp.ge.f32.partialorder %v785_v40, 0.0  ;;  %v811_v50 = vsel %vm795_vm8, %v787_v37, %v803_v42 }
 0x1b5   : > { %v684_v34 = vpop.f32.mrb[3].mxu0  ;;  %v2685_v46 = vadd.f32 %v782_v38, %v682_v33  ;;  %v806_v48 = vmul.f32 0.2, %v790_v0  ;;  %vm798_vm11 = vcmp.ge.f32.partialorder %v790_v0, 0.0  ;;  %v808_v53 = vsel %vm792_vm9, %v784_v39, %v800_v43 }
 0x1b6   : > { %v2688_v51 = vadd.f32 %v782_v38, %v684_v34  ;;  %v809_v54 = vsel %vm793_vm10, %v785_v40, %v801_v44  ;;  %vm799_vm12 = vcmp.ge.f32.partialorder %v2683_v45, 0.0  ;;  %v807_v57 = vmul.f32 0.2, %v2683_v45 }
 0x1b7   : > { %vm796_vm13 = vcmp.ge.f32.partialorder %v2685_v46, 0.0  ;;  %v804_v58 = vmul.f32 0.2, %v2685_v46  ;;  %v814_v1 = vsel %vm798_vm11, %v790_v0, %v806_v48 }
 0x1b8   : > { %vm797_vm15 = vcmp.ge.f32.partialorder %v2688_v51, 0.0  ;;  %v805_v22 = vmul.f32 0.2, %v2688_v51  ;;  %v815_v30 = vsel %vm799_vm12, %v2683_v45, %v807_v57 }
 0x1b9   : > { %v812_v31 = vsel %vm796_vm13, %v2685_v46, %v804_v58 }
 0x1ba   : > { %v813_v33 = vsel %vm797_vm15, %v2688_v51, %v805_v22 }
 0x1e6   : > { %v1725_v52 = vpop.f32.mrb[4].mxu1 }
 0x1e7   : > { %v1759_v55 = vadd.f32 %v1750_v47, %v1725_v52  ;;  %v1727_v56 = vpop.f32.mrb[5].mxu1 }
 0x1e8   : > { %v1760_v59 = vadd.f32 %v1750_v47, %v1727_v56  ;;  %v1648_v60 = vpop.f32.mrb[4].mxu0 }
 0x1e9   : > { %vm1767_vm14 = vcmp.ge.f32.partialorder %v1759_v55, 0.0  ;;  %v1775_v61 = vmul.f32 0.2, %v1759_v55  ;;  %v1757_v62 = vadd.f32 %v1750_v47, %v1648_v60  ;;  %v1650_v63 = vpop.f32.mrb[5].mxu0 }
 0x1ea   : > { %vm1768_vm0 = vcmp.ge.f32.partialorder %v1760_v59, 0.0  ;;  %v1776_v2 = vmul.f32 0.2, %v1760_v59  ;;  %v1758_v3 = vadd.f32 %v1750_v47, %v1650_v63  ;;  %v1731_v5 = vpop.f32.mrb[6].mxu1 }
 0x1eb   : > { %v1783_v6 = vsel %vm1767_vm14, %v1759_v55, %v1775_v61  ;;  %vm1765_vm1 = vcmp.ge.f32.partialorder %v1757_v62, 0.0  ;;  %v1773_v7 = vmul.f32 0.2, %v1757_v62  ;;  %v1763_v8 = vadd.f32 %v1755_v4, %v1731_v5  ;;  %v1733_v9 = vpop.f32.mrb[7].mxu1 }
 0x1ec   : > { %v1799_v10 = vadd.f32 %v1783_v6, %v810_v49  ;;  %v1784_v11 = vsel %vm1768_vm0, %v1760_v59, %v1776_v2  ;;  %vm1766_vm2 = vcmp.ge.f32.partialorder %v1758_v3, 0.0  ;;  %v1774_v12 = vmul.f32 0.2, %v1758_v3  ;;  %v1654_v13 = vpop.f32.mrb[6].mxu0 }
 0x1ed   : > { %v1800_v14 = vadd.f32 %v1784_v11, %v811_v50  ;;  %v1781_v15 = vsel %vm1765_vm1, %v1757_v62, %v1773_v7  ;;  %vm1771_vm3 = vcmp.ge.f32.partialorder %v1763_v8, 0.0  ;;  %v1779_v16 = vmul.f32 0.2, %v1763_v8  ;;  %v1656_v17 = vpop.f32.mrb[7].mxu0 }
 0x1ee   : > { %1807 = vst [vmem:[%s2705_s23 + $0x10] sm:$0xff] %v1799_v10  ;;  %v1797_v18 = vadd.f32 %v1781_v15, %v808_v53  ;;  %v1782_v19 = vsel %vm1766_vm2, %v1758_v3, %v1774_v12  ;;  %v1764_v20 = vadd.f32 %v1755_v4, %v1733_v9  ;;  %v1761_v21 = vadd.f32 %v1755_v4, %v1654_v13 }
 0x1ef   : > { %1808 = vst [vmem:[%s2705_s23 + $0x18] sm:$0xff] %v1800_v14  ;;  %v1798_v23 = vadd.f32 %v1782_v19, %v809_v54  ;;  %v1787_v24 = vsel %vm1771_vm3, %v1763_v8, %v1779_v16  ;;  %v1762_v25 = vadd.f32 %v1755_v4, %v1656_v17 }
 0x1f0   : > { %1805 = vst [vmem:[%s2705_s23] sm:$0xff] %v1797_v18  ;;  %v1803_v26 = vadd.f32 %v1787_v24, %v814_v1  ;;  %vm1772_vm4 = vcmp.ge.f32.partialorder %v1764_v20, 0.0  ;;  %v1780_v27 = vmul.f32 0.2, %v1764_v20  ;;  %vm1769_vm5 = vcmp.ge.f32.partialorder %v1761_v21, 0.0 }
 0x1f1   : > { %1806 = vst [vmem:[%s2705_s23 + $0x8] sm:$0xff] %v1798_v23  ;;  %v1777_v28 = vmul.f32 0.2, %v1761_v21  ;;  %vm1770_vm6 = vcmp.ge.f32.partialorder %v1762_v25, 0.0  ;;  %v1778_v29 = vmul.f32 0.2, %v1762_v25 }
 0x1f2   : > { %1811 = vst [vmem:[%s2705_s23 + $0x30] sm:$0xff] %v1803_v26  ;;  %v1788_v32 = vsel %vm1772_vm4, %v1764_v20, %v1780_v27 }
 0x1f3   : > { %v1804_v34 = vadd.f32 %v1788_v32, %v815_v30  ;;  %v1785_v35 = vsel %vm1769_vm5, %v1761_v21, %v1777_v28  ;;  %v1786_v36 = vsel %vm1770_vm6, %v1762_v25, %v1778_v29 }
 0x1f4   : > { %v1801_v37 = vadd.f32 %v1785_v35, %v812_v31  ;;  %v1802_v38 = vadd.f32 %v1786_v36, %v813_v33 }
 0x1f5   : > { %1812 = vst [vmem:[%s2705_s23 + $0x38] sm:$0xff] %v1804_v34 }
 0x1f6   : > { %1809 = vst [vmem:[%s2705_s23 + $0x20] sm:$0xff] %v1801_v37  ;;  %1810 = vst [vmem:[%s2705_s23 + $0x28] sm:$0xff] %v1802_v38 }
 0x1f7   : > { %2182 = shalt.err (!%p2179_p5)
}
 0x1f8   : > { %s2183_s28 = scalar_lea.hbm %s2729_s7, 1024  ;;  %s2187_s4 = scalar_lea.hbm %s2800_s3, 4096 }
 0x1f9   : > { %p2184_p11 = scmp.ne.s32.totalorder %s2729_s7, %s2183_s28  ;;  %p2188_p4 = scmp.lt.u32.totalorder %s2729_s7, %s2800_s3 }
 0x1fa   : > { %p2189_p6 = scmp.lt.u32.totalorder %s2187_s4, %s2183_s28  ;;  %p2191_p7 = scmp.lt.u32.totalorder %s2183_s28, %s2729_s7 }
 0x1fb   : > { %p2185_p12 = pnand %p2184_p11, %p2815_p0 }
 0x1fc   : > { %p2190_p9 = por %p2189_p6, %p2188_p4 }
 0x1fd   : > { %p2186_p13 = pneg %p2185_p12 }
 0x1fe   : > { %p2192_p1 = por %p2191_p7, %p2190_p9 }
 0x200   : > { %p2193_p3 = pnand %p2192_p1, %p2186_p13 }
 0x202   : > { %2196 = shalt.err (!%p2193_p3)
}
 0x203   : > { %s2306_s11 = smov 512   ;;  %s2307_s9 = smov 1024  }
 0x204   : > { %s2308_s10 = smov 32  }
 0x205   : > { %2023 = dma.vmem_to_hbm [thread:$0]  (%p2815_p0), %s2720_s19, 1024, %s2729_s7, %s2736_s29, %s2306_s11, %s2307_s9, %s2308_s10  }
 0x206 PF: > { %p2034_p10 = scmp.ge.s32.totalorder %s2291_s22, 2  ;;  %s1844_s24 = sand.u32 1, %s2251_s12  }
 0x207   : > { %p2816_p2 = scmp.ne.s32.totalorder %s2811_s5, 0  ;;  %s1845_s21 = scalar_lea.sflag [#allocation5], %s1844_s24 }
 0x209   : > { %p2030_p8 = pnand %p2034_p10, %p2816_p2 }
 0x20b   : > { %2246 = dma.done.wait (!%p2030_p8), %s1845_s21, 1024  }
 0x20c   : > { %2248 = vsyncadd (!%p2030_p8), %s1845_s21, 4294966272  ;;  %s19_s22 = sadd.s32 1, %s2291_s22   ;;  %s2817_s19 = sld [smem:[#allocation9_spill]] }
 0x20d   : > { %p16_p5 = scmp.ge.s32.totalorder %s19_s22, 6   ;;  %s2818_s6 = sld [smem:[#allocation10_spill]] }
 0x20e   : > { %s2819_s21 = sld [smem:[#allocation11_spill]]  ;;  %s2820_s12 = smov %s2255_s13 }
 0x20f   : > { %s2821_s13 = smov %s2259_s14  ;;  %s2822_s14 = smov %s2419_s15 }
 0x210   : > { %s2823_s15 = smov %s2267_s16  ;;  %s2824_s16 = smov %s2271_s17 }
 0x211   : > { %s2825_s17 = smov %s2422_s27  ;;  %s2826_s18 = smov %s2283_s20 }
 0x212   :  { %18 = sbr.rel (!%p16_p5) target bundleno = 9 (0x9), region = 79 }
 0x213   : > { %s2827_s20 = smov %s2818_s6 }
 0x219   :  { %1850 = vsyncpa [#allocation4], 1 }
 0x21a   :  { %1852 = vsyncpa [#allocation4 + $0x1], 1 }
 0x21b   :  { %1853 = vsyncpa [#allocation5], 1 }
 0x21c   :  { %1855 = vsyncpa [#allocation5 + $0x1], 1 }

</bundles_post_ra>
